<compile_context>
chip_gen: v5e
topology: v5e:2x2
jax: 0.10.0
libtpu: 0.0.40
codegen_flags: <defaults>
</compile_context>

<pallas_src>
import functools

import jax
import jax.numpy as jnp
import numpy as np
from jax.experimental import pallas as pl
from jax.experimental.pallas import tpu as pltpu

HIDDEN = 32
LANES = 128


def a2c_fused_kernel(x_ref, p_ref, out_ref, *, f_pad):
    x = x_ref[...]                                   # (TB, f_pad)

    w1 = p_ref[0:f_pad, :]                           # (f_pad, 128)  [cw1 | aw1 | 0]
    w2 = p_ref[f_pad:f_pad + LANES, :]               # (128, 128)    block-diag
    w3 = p_ref[f_pad + LANES:f_pad + 2 * LANES, :]   # (128, 128)    block-diag
    bias = p_ref[f_pad + 2 * LANES:f_pad + 2 * LANES + 8, :]  # (8, 128)
    b1 = bias[0:1, :]
    b2 = bias[1:2, :]
    b3 = bias[2:3, :]

    h = jnp.dot(x, w1, preferred_element_type=jnp.float32) + b1
    h = jnp.maximum(h, 0.0)
    h = jnp.dot(h, w2, preferred_element_type=jnp.float32) + b2
    h = jnp.maximum(h, 0.0)
    out = jnp.dot(h, w3, preferred_element_type=jnp.float32) + b3

    out_ref[...] = out.astype(out_ref.dtype)         # (TB, 128) lane-dense store


def pack_params(critic_params, actor_params, n_features, n_actions):
    """Pack critic+actor weights into one lane-padded (rows, 128) f32 slab.

    Rows:  [0, f_pad)               layer-1 weights  (cw1 cols 0:32, aw1 cols 32:64)
           [f_pad, f_pad+128)       layer-2 weights  block-diagonal
           [f_pad+128, f_pad+256)   layer-3 weights  block-diagonal (value col 0,
                                                      logits cols 1:1+A)
           [f_pad+256, f_pad+264)   biases (row 0=b1, 1=b2, 2=b3, rest zero)
    """
    f_pad = ((n_features + 7) // 8) * 8
    H = HIDDEN
    (cw1, cb1), (cw2, cb2), (cw3, cb3) = critic_params
    (aw1, ab1), (aw2, ab2), (aw3, ab3) = actor_params

    w1 = jnp.zeros((f_pad, LANES), jnp.float32)
    w1 = w1.at[:n_features, 0:H].set(cw1)
    w1 = w1.at[:n_features, H:2 * H].set(aw1)

    w2 = jnp.zeros((LANES, LANES), jnp.float32)
    w2 = w2.at[0:H, 0:H].set(cw2)
    w2 = w2.at[H:2 * H, H:2 * H].set(aw2)

    w3 = jnp.zeros((LANES, LANES), jnp.float32)
    w3 = w3.at[0:H, 0:1].set(cw3)
    w3 = w3.at[H:2 * H, 1:1 + n_actions].set(aw3)

    b = jnp.zeros((8, LANES), jnp.float32)
    b = b.at[0, 0:H].set(cb1.reshape(-1))
    b = b.at[0, H:2 * H].set(ab1.reshape(-1))
    b = b.at[1, 0:H].set(cb2.reshape(-1))
    b = b.at[1, H:2 * H].set(ab2.reshape(-1))
    b = b.at[2, 0:1].set(cb3.reshape(-1))
    b = b.at[2, 1:1 + n_actions].set(ab3.reshape(-1))

    slab = jnp.concatenate([w1, w2, w3, b], axis=0)  # (f_pad + 264, 128)
    return slab, f_pad


def a2c_forward(x, critic_params, actor_params):
    """x: (n_envs, n_features) float32. Params are lists of (W, b) with
    W already transposed to (in, out) and b of shape (1, out)."""
    n_envs, n_features = x.shape
    n_actions = actor_params[2][0].shape[1]

    slab, f_pad = pack_params(critic_params, actor_params, n_features, n_actions)

    # Pad features (kernel K-dim must match slab's f_pad rows).
    if f_pad != n_features:
        x = jnp.pad(x, ((0, 0), (0, f_pad - n_features)))

    # Batch tiling: big tiles for large rollout batches, minimal for tiny ones.
    if n_envs >= 512:
        tb = 512
    else:
        tb = max(8, ((n_envs + 7) // 8) * 8)
    b_pad = pl.cdiv(n_envs, tb) * tb
    if b_pad != n_envs:
        x = jnp.pad(x, ((0, b_pad - n_envs), (0, 0)))

    out = pl.pallas_call(
        functools.partial(a2c_fused_kernel, f_pad=f_pad),
        out_shape=jax.ShapeDtypeStruct((b_pad, LANES), jnp.float32),
        grid=(b_pad // tb,),
        in_specs=[
            pl.BlockSpec((tb, f_pad), lambda i: (i, 0)),         # x tile
            pl.BlockSpec(slab.shape, lambda i: (0, 0)),          # whole param slab
        ],
        out_specs=pl.BlockSpec((tb, LANES), lambda i: (i, 0)),
        compiler_params=pltpu.CompilerParams(
            dimension_semantics=("parallel",)),
    )(x, slab)

    state_values = out[:n_envs, 0:1]
    action_logits = out[:n_envs, 1:1 + n_actions]
    return state_values, action_logits


def init_linear(key, fan_in, fan_out):
    """Deterministic init mimicking nn.Linear default (uniform +/-1/sqrt(fan_in)).
    Returns (W: (fan_in, fan_out), b: (1, fan_out))."""
    kw, kb = jax.random.split(key)
    bound = 1.0 / np.sqrt(fan_in)
    w = jax.random.uniform(kw, (fan_in, fan_out), jnp.float32, -bound, bound)
    b = jax.random.uniform(kb, (1, fan_out), jnp.float32, -bound, bound)
    return w, b


def reference_forward(x, critic_params, actor_params):
    def mlp(x, params):
        h = x
        for i, (w, b) in enumerate(params):
            h = h @ w + b
            if i < len(params) - 1:
                h = jnp.maximum(h, 0.0)
        return h
    return mlp(x, critic_params), mlp(x, actor_params)


if __name__ == "__main__":
    n_envs = 8        # batch
    n_features = 16   # observation dim
    n_actions = 4

    key = jax.random.PRNGKey(0)
    keys = jax.random.split(key, 7)

    # critic: F -> 32 -> 32 -> 1 ; actor: F -> 32 -> 32 -> n_actions
    critic_params = [
        init_linear(keys[0], n_features, HIDDEN),
        init_linear(keys[1], HIDDEN, HIDDEN),
        init_linear(keys[2], HIDDEN, 1),
    ]
    actor_params = [
        init_linear(keys[3], n_features, HIDDEN),
        init_linear(keys[4], HIDDEN, HIDDEN),
        init_linear(keys[5], HIDDEN, n_actions),
    ]

    x = jax.random.normal(keys[6], (n_envs, n_features), jnp.float32)

    state_values, action_logits = a2c_forward(x, critic_params, actor_params)
    state_values = jax.block_until_ready(state_values)
    action_logits = jax.block_until_ready(action_logits)

    ref_values, ref_logits = reference_forward(x, critic_params, actor_params)
    assert state_values.shape == (n_envs, 1)
    assert action_logits.shape == (n_envs, n_actions)
    np.testing.assert_allclose(np.asarray(state_values), np.asarray(ref_values),
                               rtol=1e-5, atol=1e-5)
    np.testing.assert_allclose(np.asarray(action_logits), np.asarray(ref_logits),
                               rtol=1e-5, atol=1e-5)

    print("KERNEL_OK")
</pallas_src>

<mosaic_0001>
module attributes {stable_mosaic.version = 11 : i64} {
  func.func @a2c_fused_kernel(%arg0: i32, %arg1: memref<8x16xf32, #tpu.memory_space<vmem>>, %arg2: memref<280x128xf32, #tpu.memory_space<vmem>>, %arg3: memref<8x128xf32, #tpu.memory_space<vmem>>) attributes {dimension_semantics = [#tpu.dimension_semantics<parallel>], iteration_bounds = array<i64: 1>, scalar_prefetch = 0 : i64, scratch_operands = 0 : i64, tpu.core_type = #tpu.core_type<tc>, window_params = [{transform_indices = @transform_0, window_bounds = array<i64: 8, 16>}, {pipeline_mode = #tpu.pipeline_mode<synchronous>, transform_indices = @transform_1, window_bounds = array<i64: 280, 128>}, {transform_indices = @transform_2, window_bounds = array<i64: 8, 128>}]} {
    %c0 = arith.constant 0 : index
    %c0_0 = arith.constant 0 : index
    %0 = vector.load %arg1[%c0, %c0_0] : memref<8x16xf32, #tpu.memory_space<vmem>>, vector<8x16xf32>
    %c0_1 = arith.constant 0 : index
    %c0_2 = arith.constant 0 : index
    %1 = vector.load %arg2[%c0_1, %c0_2] : memref<280x128xf32, #tpu.memory_space<vmem>>, vector<16x128xf32>
    %c16 = arith.constant 16 : index
    %c0_3 = arith.constant 0 : index
    %2 = vector.load %arg2[%c16, %c0_3] : memref<280x128xf32, #tpu.memory_space<vmem>>, vector<128x128xf32>
    %c144 = arith.constant 144 : index
    %c0_4 = arith.constant 0 : index
    %3 = vector.load %arg2[%c144, %c0_4] : memref<280x128xf32, #tpu.memory_space<vmem>>, vector<128x128xf32>
    %c272 = arith.constant 272 : index
    %c0_5 = arith.constant 0 : index
    %4 = vector.load %arg2[%c272, %c0_5] : memref<280x128xf32, #tpu.memory_space<vmem>>, vector<8x128xf32>
    %5 = vector.extract_strided_slice %4 {offsets = [0, 0], sizes = [1, 128], strides = [1, 1]} : vector<8x128xf32> to vector<1x128xf32>
    %6 = vector.extract_strided_slice %4 {offsets = [1, 0], sizes = [1, 128], strides = [1, 1]} : vector<8x128xf32> to vector<1x128xf32>
    %7 = vector.extract_strided_slice %4 {offsets = [2, 0], sizes = [1, 128], strides = [1, 1]} : vector<8x128xf32> to vector<1x128xf32>
    %cst = arith.constant dense<0.000000e+00> : vector<8x128xf32>
    %8 = tpu.matmul %0, %1, %cst {dimension_numbers = #tpu.dot_dimension_numbers<[1], [0], [0], [1], [0, 0, 1, 1], [], []>} : vector<8x16xf32>, vector<16x128xf32>, vector<8x128xf32> -> vector<8x128xf32>
    %9 = vector.broadcast %5 : vector<1x128xf32> to vector<8x128xf32>
    %10 = arith.addf %8, %9 : vector<8x128xf32>
    %cst_6 = arith.constant 0.000000e+00 : f32
    %11 = vector.broadcast %cst_6 : f32 to vector<8x128xf32>
    %12 = arith.maximumf %10, %11 : vector<8x128xf32>
    %cst_7 = arith.constant dense<0.000000e+00> : vector<8x128xf32>
    %13 = tpu.matmul %12, %2, %cst_7 {dimension_numbers = #tpu.dot_dimension_numbers<[1], [0], [0], [1], [0, 0, 1, 1], [], []>} : vector<8x128xf32>, vector<128x128xf32>, vector<8x128xf32> -> vector<8x128xf32>
    %14 = vector.broadcast %6 : vector<1x128xf32> to vector<8x128xf32>
    %15 = arith.addf %13, %14 : vector<8x128xf32>
    %cst_8 = arith.constant 0.000000e+00 : f32
    %16 = vector.broadcast %cst_8 : f32 to vector<8x128xf32>
    %17 = arith.maximumf %15, %16 : vector<8x128xf32>
    %cst_9 = arith.constant dense<0.000000e+00> : vector<8x128xf32>
    %18 = tpu.matmul %17, %3, %cst_9 {dimension_numbers = #tpu.dot_dimension_numbers<[1], [0], [0], [1], [0, 0, 1, 1], [], []>} : vector<8x128xf32>, vector<128x128xf32>, vector<8x128xf32> -> vector<8x128xf32>
    %19 = vector.broadcast %7 : vector<1x128xf32> to vector<8x128xf32>
    %20 = arith.addf %18, %19 : vector<8x128xf32>
    %c0_10 = arith.constant 0 : index
    %c0_11 = arith.constant 0 : index
    %21 = vector.load %arg3[%c0_10, %c0_11] : memref<8x128xf32, #tpu.memory_space<vmem>>, vector<8x128xf32>
    tpu.vector_store %arg3[%c0_10, %c0_11], %20 {strides = array<i32>} : memref<8x128xf32, #tpu.memory_space<vmem>>, vector<8x128xf32>,
    return
  }
  func.func @transform_0(%arg0: i32) -> (i32, i32) {
    %c0_i32 = arith.constant 0 : i32
    %c0_i32_0 = arith.constant 0 : i32
    return %arg0, %c0_i32 : i32, i32
  }
  func.func @transform_1(%arg0: i32) -> (i32, i32) {
    %c0_i32 = arith.constant 0 : i32
    %c0_i32_0 = arith.constant 0 : i32
    %c0_i32_1 = arith.constant 0 : i32
    return %c0_i32, %c0_i32_0 : i32, i32
  }
  func.func @transform_2(%arg0: i32) -> (i32, i32) {
    %c0_i32 = arith.constant 0 : i32
    %c0_i32_0 = arith.constant 0 : i32
    return %arg0, %c0_i32 : i32, i32
  }
}

</mosaic_0001>

<bundles_post_ra>
// kernel: tpu_custom_call.1
= control target key start
LH: loop header
LB: loop body
LE: loop exit
PB: predicated region body
PF: predicated region fallthrough
CT: control target
= control target key end

     0   :  { %7 = vsyncpa [#allocation3], 0  ;;  %s279_s0 = inlined_call_operand.hbm [shape: f32[8,16], index: 0, kind: input, shape index: {}]   ;;  %s280_s1 = inlined_call_operand.hbm [shape: f32[280,128], index: 1, kind: input, shape index: {}]   ;;  %s281_s2 = inlined_call_operand.hbm [shape: f32[8,128], index: 2, kind: output, shape index: {}]  }
   0x1   :  { %8 = vsyncpa [#allocation6], 0 }
   0x2   :  { %9 = vsyncpa [#allocation4], 0  ;;  %s15_s11 = sshll.u32 %s279_s0, 4  ;;  %s250_s12 = smov [#allocation2]   ;;  %s16_s11 = int_to_ptr.hbm [resolvable:$true] %s15_s11 }
   0x3   :  { %s17_s13 = sshll.u32 %s250_s12, 4  ;;  %s25_s16 = sshll.u32 %s280_s1, 4  ;;  %s18_s13 = int_to_ptr.vmem [resolvable:$true] %s17_s13  ;;  %s26_s16 = int_to_ptr.hbm [resolvable:$true] %s25_s16 }
   0x4   :  { %20 = dma.hbm_to_vmem [thread:$0]  %s16_s11, 128, %s18_s13, [#allocation3]  }
   0x5   :  { %s251_s17 = smov [#allocation5]   ;;  %s252_s19 = smov 128  }
   0x6   :  { %s27_s18 = sshll.u32 %s251_s17, 4  ;;  %s253_s20 = smov 8   ;;  %s28_s18 = int_to_ptr.vmem [resolvable:$true] %s27_s18 }
   0x7   :  { %33 = dma.hbm_to_vmem [thread:$0]  %s26_s16, 4480, %s28_s18, [#allocation6], %s252_s19, %s252_s19, %s253_s20  }
   0x8   :  { %244 = dma.done.wait [#allocation3], 128  }
   0x9   :  { %245 = vsyncadd [#allocation3], 4294967168 }
   0xa   :  { %246 = dma.done.wait [#allocation6], 4480  }
   0xb   :  { %247 = vsyncadd [#allocation6], 4294962816  ;;  %v44_v0 = vld [vmem:[#allocation5 + $0x8] sm:$0xff]  ;;  %v43_v1 = vld [vmem:[#allocation5] sm:$0xff]  ;;  %vm79_vm0 = vcmask 130048   ;;  %s254_s0 = smov [#allocation7]  }
   0xc   :  { %97 = vmatpush.msra.mxu0 %v44_v0  ;;  %v42_v2 = vld [vmem:[#allocation2] sm:$0xff]  ;;  %v60_v3 = vld [vmem:[#allocation5 + $0x88] sm:$0xff]  ;;  %v59_v4 = vld [vmem:[#allocation5 + $0x80] sm:$0xff]  ;;  %s153_s1 = sshll.u32 %s254_s0, 4  ;;  %s155_s23 = sshll.u32 %s281_s2, 4  ;;  %s154_s1 = int_to_ptr.vmem [resolvable:$true] %s153_s1  ;;  %s156_s23 = int_to_ptr.hbm [resolvable:$true] %s155_s23 }
   0xd   :  { %105 = vmatpush.msra.mxu1 %v60_v3  ;;  %v58_v5 = vld [vmem:[#allocation5 + $0x78] sm:$0xff]  ;;  %v57_v6 = vld [vmem:[#allocation5 + $0x70] sm:$0xff]  ;;  %v56_v7 = vld [vmem:[#allocation5 + $0x68] sm:$0xff] }
   0xe   :  { %98 = vmatpush.msra.mxu0 %v43_v1  ;;  %v55_v8 = vld [vmem:[#allocation5 + $0x60] sm:$0xff]  ;;  %v54_v9 = vld [vmem:[#allocation5 + $0x58] sm:$0xff]  ;;  %v53_v10 = vld [vmem:[#allocation5 + $0x50] sm:$0xff] }
   0xf   :  { %166 = vmatmul.msk.f32.vlgmr.msra.gmra.mxu0 %vm79_vm0, %v42_v2  ;;  %106 = vmatpush.msra.mxu1 %v59_v4  ;;  %v52_v11 = vld [vmem:[#allocation5 + $0x48] sm:$0xff]  ;;  %v51_v12 = vld [vmem:[#allocation5 + $0x40] sm:$0xff]  ;;  %v50_v13 = vld [vmem:[#allocation5 + $0x38] sm:$0xff] }
  0x10   :  { %v49_v14 = vld [vmem:[#allocation5 + $0x30] sm:$0xff]  ;;  %v48_v15 = vld [vmem:[#allocation5 + $0x28] sm:$0xff]  ;;  %v47_v16 = vld [vmem:[#allocation5 + $0x20] sm:$0xff] }
  0x11   :  { %107 = vmatpush.msra.mxu1 %v58_v5  ;;  %v46_v17 = vld [vmem:[#allocation5 + $0x18] sm:$0xff]  ;;  %v45_v18 = vld [vmem:[#allocation5 + $0x10] sm:$0xff]  ;;  %v76_v19 = vld [vmem:[#allocation5 + $0x108] sm:$0xff] }
  0x12   :  { %v75_v20 = vld [vmem:[#allocation5 + $0x100] sm:$0xff]  ;;  %127 = vmatpush.msra.mxu2 %v76_v19  ;;  %v74_v21 = vld [vmem:[#allocation5 + $0xf8] sm:$0xff]  ;;  %v73_v22 = vld [vmem:[#allocation5 + $0xf0] sm:$0xff] }
  0x13   :  { %108 = vmatpush.msra.mxu1 %v57_v6  ;;  %v72_v23 = vld [vmem:[#allocation5 + $0xe8] sm:$0xff]  ;;  %v71_v24 = vld [vmem:[#allocation5 + $0xe0] sm:$0xff]  ;;  %v70_v25 = vld [vmem:[#allocation5 + $0xd8] sm:$0xff] }
  0x14   :  { %128 = vmatpush.msra.mxu2 %v75_v20  ;;  %v69_v26 = vld [vmem:[#allocation5 + $0xd0] sm:$0xff]  ;;  %v68_v27 = vld [vmem:[#allocation5 + $0xc8] sm:$0xff]  ;;  %v67_v28 = vld [vmem:[#allocation5 + $0xc0] sm:$0xff] }
  0x15   :  { %109 = vmatpush.msra.mxu1 %v56_v7  ;;  %v66_v29 = vld [vmem:[#allocation5 + $0xb8] sm:$0xff]  ;;  %v65_v30 = vld [vmem:[#allocation5 + $0xb0] sm:$0xff]  ;;  %v64_v32 = vld [vmem:[#allocation5 + $0xa8] sm:$0xff] }
  0x16   :  { %129 = vmatpush.msra.mxu2 %v74_v21  ;;  %v77_v31 = vld [vmem:[#allocation5 + $0x110] sm:$0xff]  ;;  %v63_v37 = vld [vmem:[#allocation5 + $0xa0] sm:$0xff]  ;;  %v62_v38 = vld [vmem:[#allocation5 + $0x98] sm:$0xff] }
  0x17   :  { %110 = vmatpush.msra.mxu1 %v55_v8  ;;  %v78_v33 = vperm.slane %v77_v31, 0  ;;  %v61_v39 = vld [vmem:[#allocation5 + $0x90] sm:$0xff]  ;;  %v104_v40 = vperm.slane %v77_v31, 1  ;;  %v126_v44 = vperm.slane %v77_v31, 2 }
  0x18   :  { %130 = vmatpush.msra.mxu2 %v73_v22 }
  0x19   :  { %111 = vmatpush.msra.mxu1 %v54_v9 }
  0x1a   :  { %131 = vmatpush.msra.mxu2 %v72_v23 }
  0x1b   :  { %112 = vmatpush.msra.mxu1 %v53_v10 }
  0x1c   :  { %132 = vmatpush.msra.mxu2 %v71_v24 }
  0x1d   :  { %113 = vmatpush.msra.mxu1 %v52_v11 }
  0x1e   :  { %133 = vmatpush.msra.mxu2 %v70_v25 }
  0x1f   :  { %114 = vmatpush.msra.mxu1 %v51_v12 }
  0x20   :  { %134 = vmatpush.msra.mxu2 %v69_v26 }
  0x21   :  { %115 = vmatpush.msra.mxu1 %v50_v13 }
  0x22   :  { %135 = vmatpush.msra.mxu2 %v68_v27 }
  0x23   :  { %116 = vmatpush.msra.mxu1 %v49_v14 }
  0x24   :  { %136 = vmatpush.msra.mxu2 %v67_v28 }
  0x25   :  { %117 = vmatpush.msra.mxu1 %v48_v15 }
  0x26   :  { %137 = vmatpush.msra.mxu2 %v66_v29 }
  0x27   :  { %118 = vmatpush.msra.mxu1 %v47_v16 }
  0x28   :  { %138 = vmatpush.msra.mxu2 %v65_v30 }
  0x29   :  { %119 = vmatpush.msra.mxu1 %v46_v17 }
  0x2a   :  { %139 = vmatpush.msra.mxu2 %v64_v32 }
  0x2b   :  { %120 = vmatpush.msra.mxu1 %v45_v18 }
  0x2c   :  { %140 = vmatpush.msra.mxu2 %v63_v37 }
  0x2e   :  { %141 = vmatpush.msra.mxu2 %v62_v38 }
  0x30   :  { %142 = vmatpush.msra.mxu2 %v61_v39 }
  0x8c   :  { %v100_v34 = vpop.f32.mrf.mxu0 }
  0x8d   :  { %v101_v35 = vadd.f32 %v100_v34, %v78_v33 }
  0x8f   :  { %v103_v36 = vmax.f32 %v101_v35, 0.0 }
  0x91   :  { %121 = vmatmul.f32.vlgmr.msra.gmra.mxu1 %v103_v36 }
 0x10e   :  { %v122_v41 = vpop.f32.mrf.mxu1 }
 0x10f   :  { %v123_v42 = vadd.f32 %v122_v41, %v104_v40 }
 0x111   :  { %v125_v43 = vmax.f32 %v123_v42, 0.0 }
 0x113   :  { %143 = vmatmul.f32.vlgmr.msra.gmra.mxu2 %v125_v43 }
 0x196   :  { %v144_v45 = vpop.f32.mrf.mxu2 }
 0x197   :  { %v145_v46 = vadd.f32 %v144_v45, %v126_v44 }
 0x199   :  { %147 = vst [vmem:[#allocation7] sm:$0xff] %v145_v46 }
 0x19a   :  { %158 = dma.vmem_to_hbm [thread:$0]  %s154_s1, 128, %s156_s23, [#allocation4]  }
 0x19b   :  { %248 = dma.done.wait [#allocation4], 128  }
 0x19c   :  { %249 = vsyncadd [#allocation4], 4294967168 }
 0x19d   :  { %163 = vsyncpa [#allocation3], 1 }
 0x19e   :  { %164 = vsyncpa [#allocation6], 1 }
 0x19f   :  { %165 = vsyncpa [#allocation4], 1 }

</bundles_post_ra>
